<compile_context>
chip_gen: v7x
topology: tpu7x:2x2x1
jax: 0.10.0
libtpu: 0.0.40
codegen_flags: <defaults>
</compile_context>

<pallas_src>
import functools

import jax
import jax.numpy as jnp
from jax.experimental import pallas as pl
from jax.experimental.pallas import tpu as pltpu


def _composite_affine_kernel(x_ref, scale_ref, shift_ref, y_ref, *, num_transforms):
    # x_ref:     (TB, D)  input tile
    # scale_ref: (K, D)   per-transform, per-feature scales (resident in VMEM)
    # shift_ref: (K, D)   per-transform, per-feature shifts (resident in VMEM)
    # y_ref:     (TB, D)  output tile (lane-dense, unmasked stores)
    x = x_ref[...].astype(jnp.float32)
    # Cascade: apply each transform in order (mirrors CompositeTransform._cascade).
    for k in range(num_transforms):
        s = scale_ref[k : k + 1, :].astype(jnp.float32)  # (1, D) broadcast over rows
        b = shift_ref[k : k + 1, :].astype(jnp.float32)  # (1, D)
        x = x * s + b                                    # elementwise hot path (VPU)
    y_ref[...] = x.astype(y_ref.dtype)


def _pick_tile_b(B, D, *, dtype_bytes=4, vmem_budget_bytes=8 << 20, max_tile=1024):
    """Largest multiple-of-8 row tile that fits a conservative VMEM budget.

    Budget covers 4 tile-sized f32 buffers (double-buffered x input + y output),
    which stays well inside the scoped VMEM default on v5e/v6e/v7x.
    Also caps the tile so the grid has >=2 steps when the batch allows it,
    letting v7x shard the parallel axis across its 2 TensorCores.
    """
    rows_budget = (vmem_budget_bytes // (4 * D * dtype_bytes)) // 8 * 8
    tile = max(8, min(max_tile, rows_budget))
    half_b = -(-B // 2)               # ceil(B/2)
    half_b = -(-half_b // 8) * 8      # round up to multiple of 8
    return max(8, min(tile, half_b))


def composite_transform_forward(x, scales, shifts, *, tile_b=None):
    """Forward of CompositeTransform([Affine_1, ..., Affine_K]).

    Args:
      x:      (B, D) float32 inputs.
      scales: (K, D) float32 per-transform scales.
      shifts: (K, D) float32 per-transform shifts.
    Returns:
      outputs:         (B, D) float32
      total_logabsdet: (B,)   float32
    """
    B, D = x.shape
    K, _ = scales.shape

    if tile_b is None:
        tile_b = _pick_tile_b(B, D)
    tile_b = max(8, (tile_b // 8) * 8)

    num_tiles = -(-B // tile_b)          # ceil-div: no divisibility requirement
    Bp = num_tiles * tile_b
    xp = x if Bp == B else jnp.pad(x, ((0, Bp - B), (0, 0)))

    kernel = functools.partial(_composite_affine_kernel, num_transforms=K)

    y = pl.pallas_call(
        kernel,
        out_shape=jax.ShapeDtypeStruct((Bp, D), x.dtype),
        grid_spec=pltpu.PrefetchScalarGridSpec(
            num_scalar_prefetch=0,
            grid=(num_tiles,),
            in_specs=[
                pl.BlockSpec((tile_b, D), lambda i: (i, 0)),  # x tile
                pl.BlockSpec((K, D), lambda i: (0, 0)),       # scales (resident)
                pl.BlockSpec((K, D), lambda i: (0, 0)),       # shifts (resident)
            ],
            out_specs=pl.BlockSpec((tile_b, D), lambda i: (i, 0)),
        ),
        compiler_params=pltpu.CompilerParams(
            dimension_semantics=("parallel",),
        ),
    )(xp, scales, shifts)

    if Bp != B:
        y = y[:B]

    # logabsdet depends only on the scales, not on x: compute once in the
    # wrapper (per-transform sum over features, then accumulate over K, same
    # order as the PyTorch cascade) and broadcast to the batch.
    lad_per_k = jnp.sum(jnp.log(jnp.abs(scales.astype(jnp.float32))), axis=1)  # (K,)
    total_logabsdet = jnp.broadcast_to(jnp.sum(lad_per_k), (B,))
    return y, total_logabsdet


def _reference_forward(x, scales, shifts):
    """Pure-JAX reference mirroring CompositeTransform._cascade."""
    outputs = x
    total_lad = jnp.zeros((x.shape[0],), dtype=jnp.float32)
    for k in range(scales.shape[0]):
        outputs = outputs * scales[k][None, :] + shifts[k][None, :]
        total_lad = total_lad + jnp.sum(jnp.log(jnp.abs(scales[k])))
    return outputs, total_lad


if __name__ == "__main__":
    key = jax.random.PRNGKey(0)
    k_x, k_s, k_b = jax.random.split(key, 3)

    B, D, K = 20, 128, 3  # batch (not a multiple of 8 -> exercises padding), features, K transforms

    x = jax.random.normal(k_x, (B, D), dtype=jnp.float32)
    scales = 0.5 + jax.random.uniform(k_s, (K, D), dtype=jnp.float32)
    shifts = 0.1 * jax.random.normal(k_b, (K, D), dtype=jnp.float32)

    y, logabsdet = composite_transform_forward(x, scales, shifts)
    y = jax.block_until_ready(y)
    logabsdet = jax.block_until_ready(logabsdet)

    y_ref, lad_ref = _reference_forward(x, scales, shifts)

    assert y.shape == (B, D) and logabsdet.shape == (B,)
    assert jnp.allclose(y, y_ref, atol=1e-5, rtol=1e-5)
    assert jnp.allclose(logabsdet, lad_ref, atol=1e-4, rtol=1e-5)

    print("KERNEL_OK")
</pallas_src>

<mosaic_0001>
module attributes {stable_mosaic.version = 11 : i64} {
  func.func @_composite_affine_kernel(%arg0: i32, %arg1: memref<16x128xf32, #tpu.memory_space<vmem>>, %arg2: memref<3x128xf32, #tpu.memory_space<vmem>>, %arg3: memref<3x128xf32, #tpu.memory_space<vmem>>, %arg4: memref<16x128xf32, #tpu.memory_space<vmem>>) attributes {dimension_semantics = [#tpu.dimension_semantics<parallel>], iteration_bounds = array<i64: 2>, scalar_prefetch = 0 : i64, scratch_operands = 0 : i64, tpu.core_type = #tpu.core_type<tc>, window_params = [{transform_indices = @transform_0, window_bounds = array<i64: 16, 128>}, {pipeline_mode = #tpu.pipeline_mode<synchronous>, transform_indices = @transform_1, window_bounds = array<i64: 3, 128>}, {pipeline_mode = #tpu.pipeline_mode<synchronous>, transform_indices = @transform_2, window_bounds = array<i64: 3, 128>}, {transform_indices = @transform_3, window_bounds = array<i64: 16, 128>}]} {
    %c0 = arith.constant 0 : index
    %c0_0 = arith.constant 0 : index
    %0 = vector.load %arg1[%c0, %c0_0] : memref<16x128xf32, #tpu.memory_space<vmem>>, vector<16x128xf32>
    %c0_1 = arith.constant 0 : index
    %c0_2 = arith.constant 0 : index
    %1 = vector.load %arg2[%c0_1, %c0_2] : memref<3x128xf32, #tpu.memory_space<vmem>>, vector<1x128xf32>
    %c0_3 = arith.constant 0 : index
    %c0_4 = arith.constant 0 : index
    %2 = vector.load %arg3[%c0_3, %c0_4] : memref<3x128xf32, #tpu.memory_space<vmem>>, vector<1x128xf32>
    %3 = vector.broadcast %1 : vector<1x128xf32> to vector<16x128xf32>
    %4 = arith.mulf %0, %3 : vector<16x128xf32>
    %5 = vector.broadcast %2 : vector<1x128xf32> to vector<16x128xf32>
    %6 = arith.addf %4, %5 : vector<16x128xf32>
    %c1 = arith.constant 1 : index
    %c0_5 = arith.constant 0 : index
    %7 = vector.load %arg2[%c1, %c0_5] : memref<3x128xf32, #tpu.memory_space<vmem>>, vector<1x128xf32>
    %c1_6 = arith.constant 1 : index
    %c0_7 = arith.constant 0 : index
    %8 = vector.load %arg3[%c1_6, %c0_7] : memref<3x128xf32, #tpu.memory_space<vmem>>, vector<1x128xf32>
    %9 = vector.broadcast %7 : vector<1x128xf32> to vector<16x128xf32>
    %10 = arith.mulf %6, %9 : vector<16x128xf32>
    %11 = vector.broadcast %8 : vector<1x128xf32> to vector<16x128xf32>
    %12 = arith.addf %10, %11 : vector<16x128xf32>
    %c2 = arith.constant 2 : index
    %c0_8 = arith.constant 0 : index
    %13 = vector.load %arg2[%c2, %c0_8] : memref<3x128xf32, #tpu.memory_space<vmem>>, vector<1x128xf32>
    %c2_9 = arith.constant 2 : index
    %c0_10 = arith.constant 0 : index
    %14 = vector.load %arg3[%c2_9, %c0_10] : memref<3x128xf32, #tpu.memory_space<vmem>>, vector<1x128xf32>
    %15 = vector.broadcast %13 : vector<1x128xf32> to vector<16x128xf32>
    %16 = arith.mulf %12, %15 : vector<16x128xf32>
    %17 = vector.broadcast %14 : vector<1x128xf32> to vector<16x128xf32>
    %18 = arith.addf %16, %17 : vector<16x128xf32>
    %c0_11 = arith.constant 0 : index
    %c0_12 = arith.constant 0 : index
    %19 = vector.load %arg4[%c0_11, %c0_12] : memref<16x128xf32, #tpu.memory_space<vmem>>, vector<16x128xf32>
    tpu.vector_store %arg4[%c0_11, %c0_12], %18 {strides = array<i32>} : memref<16x128xf32, #tpu.memory_space<vmem>>, vector<16x128xf32>,
    return
  }
  func.func @transform_0(%arg0: i32) -> (i32, i32) {
    %c0_i32 = arith.constant 0 : i32
    %c0_i32_0 = arith.constant 0 : i32
    return %arg0, %c0_i32 : i32, i32
  }
  func.func @transform_1(%arg0: i32) -> (i32, i32) {
    %c0_i32 = arith.constant 0 : i32
    %c0_i32_0 = arith.constant 0 : i32
    %c0_i32_1 = arith.constant 0 : i32
    return %c0_i32, %c0_i32_0 : i32, i32
  }
  func.func @transform_2(%arg0: i32) -> (i32, i32) {
    %c0_i32 = arith.constant 0 : i32
    %c0_i32_0 = arith.constant 0 : i32
    %c0_i32_1 = arith.constant 0 : i32
    return %c0_i32, %c0_i32_0 : i32, i32
  }
  func.func @transform_3(%arg0: i32) -> (i32, i32) {
    %c0_i32 = arith.constant 0 : i32
    %c0_i32_0 = arith.constant 0 : i32
    return %arg0, %c0_i32 : i32, i32
  }
}

</mosaic_0001>

<bundles_post_ra>
// kernel: tpu_custom_call.1
= control target key start
LH: loop header
LB: loop body
LE: loop exit
PB: predicated region body
PF: predicated region fallthrough
CT: control target
= control target key end

     0   :  { %8 = vsyncpa [#allocation3], 0  ;;  %s796_s0 = inlined_call_operand.hbm [shape: f32[32,128], index: 0, kind: input, shape index: {}]   ;;  %s797_s1 = inlined_call_operand.hbm [shape: f32[3,128], index: 1, kind: input, shape index: {}]   ;;  %s798_s2 = inlined_call_operand.vmem [shape: f32[3,128], index: 2, kind: input, shape index: {}]   ;;  %s799_s3 = inlined_call_operand.hbm [shape: f32[32,128], index: 3, kind: output, shape index: {}]  }
   0x1   :  { %10 = vsyncpa [#allocation3 + $0x1], 0 }
   0x2   :  { %11 = vsyncpa [#allocation6], 0 }
   0x3   :  { %12 = vsyncpa [#allocation4], 0 }
   0x4   :  { %14 = vsyncpa [#allocation4 + $0x1], 0  ;;  %s589_s12 = smov 0   ;;  %s591_s13 = smov 0  }
   0x5   :  { %s593_s14 = smov 0   ;;  %s595_s15 = smov 0  }
   0x6 LB: > { %s610_s16 = sadd.s32 4294967295, %s560_s15   ;;  %s347_s17 = sadd.s32 4294967294, %s560_s15   ;;  %s560_s15 = sphi %s595_s15, %s824_s15   ;;  %s556_s14 = sphi %s593_s14, %s823_s14   ;;  %s552_s13 = sphi %s591_s13, %s822_s13   ;;  %s548_s12 = sphi %s589_s12, %s821_s12  }
   0x7   : > { %s614_s18 = sadd.s32 1, %s560_s15   ;;  %s27_s19 = sadd.s32 1, %s556_s14 }
   0x8   : > { %s24_s20 = ssub.s32 %s560_s15, %s614_s18  ;;  %p34_p0 = scmp.ne.s32.totalorder %s556_s14, %s552_s13 }
   0x9   : > { %p25_p1 = scmp.eq.s32.totalorder %s24_s20, 0  ;;  %p35_p2 = scmp.eq.s32.totalorder %s560_s15, 0 }
   0xa   : > { %p40_p3 = scmp.ne.s32.totalorder %s552_s13, %s548_s12  ;;  %p800_p4 = scmp.eq.s32.totalorder %s610_s16, 0 }
   0xb   : > { %s626_s21 = scalar_select %p25_p1, %s556_s14, %s27_s19  }
   0xc   : > { %p628_p5 = por %p35_p2, %p34_p0  ;;  %p634_p6 = por %p800_p4, %p40_p3 }
   0xd   : > { %p106_p7 = scmp.eq.s32.totalorder %s610_s16, 1  ;;  %p112_p8 = scmp.eq.s32.totalorder %s347_s17, 1 }
   0xe   : > { %s806_s23 = scalar_select %p634_p6, 1, 0 }
   0xf   : > { %p348_p9 = scmp.ge.s32.totalorder %s560_s15, 1  ;;  %p119_p10 = scmp.lt.s32.totalorder %s560_s15, 3 }
  0x10   : > { %p641_p11 = por %p106_p7, %p34_p0  ;;  %p645_p12 = por %p112_p8, %p40_p3 }
  0x11   : > { %p649_p13 = pnand %p348_p9, %p119_p10  ;;  %s562_s27 = smov [#allocation5]  }
  0x12   : > { %s807_s24 = scalar_select %p641_p11, 1, 0 }
  0x13   : > { %s808_s25 = scalar_select %p645_p12, 1, 0 }
  0x14   : > { %s809_s26 = scalar_select %p649_p13, 1, 0 }
  0x15   : > { %p379_p2 = pneg %p649_p13  ;;  %s132_s28 = sshll.u32 %s562_s27, 4  ;;  %s133_s28 = int_to_ptr.vmem [resolvable:$true] %s132_s28 }
  0x16   : > { %p392_p4 = scmp.lt.s32.totalorder %s560_s15, 2  ;;  %p810_p0 = scmp.eq.s32.totalorder %s610_s16, 0 }
  0x17   : > { %s146_s30 = sand.u32 1, %s556_s14   ;;  %s432_s8 = scalar_lea.hbm %s797_s1, 64 }
  0x18   : > { %p659_p7 = pnand %p379_p2, %p810_p0  ;;  %p666_p3 = pnand %p392_p4, %p628_p5 }
  0x19   : > { %s351_s5 = sshll.u32 %s146_s30, 4  ;;  %p433_p8 = scmp.ne.s32.totalorder %s797_s1, %s432_s8 }
  0x1a   : > { %s812_s4 = scalar_select %p666_p3, 1, 0 }
  0x1b   : > { %p434_p9 = pneg %p659_p7  ;;  %p439_p4 = scmp.lt.u32.totalorder %s432_s8, %s797_s1 }
  0x1d   : > { %p435_p10 = pnand %p434_p9, %p433_p8 }
  0x1f   : > { %p436_p2 = pneg %p435_p10 }
  0x21   : > { %p441_p5 = pnand %p439_p4, %p436_p2 }
  0x23   : > { %444 = shalt.err (!%p441_p5)
}
  0x24   : > { %s445_s19 = scalar_lea.vmem %s133_s28, 64  ;;  %p453_p11 = scmp.lt.s32.totalorder %s133_s28, %s133_s28 }
  0x25   : > { %p446_p0 = scmp.ne.s32.totalorder %s133_s28, %s445_s19  ;;  %p454_p6 = scmp.lt.s32.totalorder %s445_s19, %s445_s19 }
  0x27   : > { %p448_p1 = pnand %p446_p0, %p434_p9  ;;  %p455_p13 = por %p454_p6, %p453_p11 }
  0x29   : > { %p449_p12 = pneg %p448_p1 }
  0x2b   : > { %p456_p3 = pnand %p455_p13, %p449_p12 }
  0x2d   : > { %459 = shalt.err (!%p456_p3)
}
  0x2e   : > { %382 = dma.hbm_to_vmem [thread:$0]  (!%p659_p7), %s797_s1, 64, %s133_s28, [#allocation6]  }
  0x2f   : > { %s369_s27 = sshll.u32 %s560_s15, 8  ;;  %s150_s6 = scalar_lea.vmem [#allocation2], %s351_s5 }
  0x30   : > { %s157_s7 = sshll.u32 %s150_s6, 4  ;;  %s690_s10 = scalar_lea.hbm %s796_s0, %s369_s27  ;;  %s692_s7 = int_to_ptr.vmem [resolvable:$true] %s157_s7 }
  0x31   : > { %s694_s29 = scalar_lea.sflag [#allocation3], %s146_s30  ;;  %s460_s11 = scalar_lea.hbm %s690_s10, 256 }
  0x32   : > { %p461_p6 = scmp.ne.s32.totalorder %s690_s10, %s460_s11  ;;  %p813_p11 = scmp.ne.s32.totalorder %s812_s4, 0 }
  0x33   : > { %s465_s17 = scalar_lea.hbm %s796_s0, 512  ;;  %p466_p7 = scmp.lt.u32.totalorder %s690_s10, %s796_s0 }
  0x34   : > { %p462_p12 = pneg %p813_p11  ;;  %p467_p3 = scmp.lt.u32.totalorder %s465_s17, %s460_s11 }
  0x35   : > { %p469_p9 = scmp.lt.u32.totalorder %s460_s11, %s690_s10 }
  0x36   : > { %p463_p13 = pnand %p462_p12, %p461_p6  ;;  %p468_p8 = por %p467_p3, %p466_p7 }
  0x38   : > { %p464_p1 = pneg %p463_p13  ;;  %p470_p10 = por %p469_p9, %p468_p8 }
  0x3a   : > { %p471_p2 = pnand %p470_p10, %p464_p1 }
  0x3c   : > { %474 = shalt.err (!%p471_p2)
}
  0x3d   : > { %s475_s30 = scalar_lea.vmem %s692_s7, 256  ;;  %s563_s22 = smov [#allocation2]  }
  0x3e   : > { %p476_p4 = scmp.ne.s32.totalorder %s692_s7, %s475_s30  ;;  %s480_s27 = sshll.u32 %s563_s22, 4  ;;  %s481_s27 = int_to_ptr.vmem [resolvable:$false] %s480_s27 }
  0x3f   : > { %s482_s6 = scalar_lea.vmem %s481_s27, 512  ;;  %p483_p6 = scmp.lt.s32.totalorder %s692_s7, %s481_s27 }
  0x40   : > { %p478_p5 = pnand %p476_p4, %p462_p12  ;;  %p484_p13 = scmp.lt.s32.totalorder %s482_s6, %s475_s30 }
  0x42   : > { %p479_p0 = pneg %p478_p5  ;;  %p485_p7 = por %p484_p13, %p483_p6 }
  0x44   : > { %p486_p3 = pnand %p485_p7, %p479_p0 }
  0x46   : > { %489 = shalt.err (!%p486_p3)
}
  0x47   : > { %s564_s8 = smov 128   ;;  %s565_s9 = smov 8  }
  0x48   : > { %386 = dma.hbm_to_vmem [thread:$0]  (!%p813_p11), %s690_s10, 256, %s692_s7, %s694_s29, %s564_s8, %s564_s8, %s565_s9  }
  0x49   : > { %p814_p12 = scmp.ne.s32.totalorder %s809_s26, 0 }
  0x4a   : > { %s725_s11 = sand.u32 (!%p814_p12), 1, %s552_s13   ;;  %p815_p1 = scmp.ne.s32.totalorder (!%p814_p12), %s806_s23, 0 }
  0x4b   : > { %169 = sbr.rel (%p814_p12) target bundleno = 115 (0x73), region = 32  ;;  %s355_s28 = sshll.u32 (!%p814_p12), %s725_s11, 4 }
  0x4c   : > { %s172_s5 = scalar_lea.sflag (!%p814_p12), [#allocation3], %s725_s11  ;;  %s175_s17 = scalar_lea.vmem (!%p814_p12), [#allocation2], %s355_s28 }
  0x52   : > { %535 = dma.done.wait (%p815_p1), %s172_s5, 256  }
  0x53   : > { %537 = vsyncadd (%p815_p1), %s172_s5, 4294967040  ;;  %p816_p8 = scmp.eq.s32.totalorder %s610_s16, 0 }
  0x55   : > { %539 = dma.done.wait (%p816_p8), [#allocation6], 64   ;;  %p817_p11 = pmov %p816_p8 }
  0x56   : > { %v204_v0 = vld [vmem:[%s175_s17] sm:$0xff]  ;;  %v205_v5 = vld [vmem:[%s175_s17 + $0x8] sm:$0xff]  ;;  %s201_s19 = scalar_lea.vmem [#allocation7], %s355_s28  ;;  %s370_s30 = sshll.u32 %s610_s16, 8 }
  0x57   : > { %541 = vsyncadd (%p817_p11), [#allocation6], 4294967232  ;;  %v358_v1 = vld [vmem:[#allocation5] ss:$0 sm:$0xff]  ;;  %v360_v4 = vld [vmem:[#allocation5 + $0x1] ss:$0 sm:$0xff]  ;;  %s752_s6 = scalar_lea.hbm %s799_s3, %s370_s30 }
  0x58   : > { %v359_v2 = vld [vmem:[%s798_s2] ss:$0 sm:$0xff]  ;;  %v212_v3 = vmul.f32 %v358_v1, %v204_v0  ;;  %v213_v7 = vmul.f32 %v358_v1, %v205_v5  ;;  %v361_v8 = vld [vmem:[%s798_s2 + $0x1] ss:$0 sm:$0xff]  ;;  %v362_v11 = vld [vmem:[#allocation5 + $0x2] ss:$0 sm:$0xff] }
  0x59   : > { %v363_v14 = vld [vmem:[%s798_s2 + $0x2] ss:$0 sm:$0xff]  ;;  %s264_s20 = sshll.u32 %s201_s19, 4  ;;  %s251_s8 = scalar_lea.sflag [#allocation4], %s725_s11  ;;  %s747_s20 = int_to_ptr.vmem [resolvable:$true] %s264_s20 }
  0x5a   : > { %v218_v6 = vadd.f32 %v359_v2, %v212_v3  ;;  %v219_v10 = vadd.f32 %v359_v2, %v213_v7  ;;  %s490_s9 = scalar_lea.vmem %s747_s20, 256  ;;  %p818_p10 = scmp.ne.s32.totalorder %s807_s24, 0 }
  0x5b   : > { %p491_p9 = scmp.ne.s32.totalorder %s747_s20, %s490_s9  ;;  %s566_s16 = smov [#allocation7]  }
  0x5c   : > { %v226_v9 = vmul.f32 %v360_v4, %v218_v6  ;;  %v227_v13 = vmul.f32 %v360_v4, %v219_v10  ;;  %s494_s28 = sshll.u32 %s566_s16, 4  ;;  %s495_s28 = int_to_ptr.vmem [resolvable:$false] %s494_s28 }
  0x5d   : > { %p492_p2 = pnand %p491_p9, %p818_p10  ;;  %s496_s5 = scalar_lea.vmem %s495_s28, 512 }
  0x5e   : > { %v232_v12 = vadd.f32 %v361_v8, %v226_v9  ;;  %v233_v16 = vadd.f32 %v361_v8, %v227_v13  ;;  %p497_p5 = scmp.lt.s32.totalorder %s747_s20, %s495_s28  ;;  %p498_p0 = scmp.lt.s32.totalorder %s496_s5, %s490_s9 }
  0x5f   : > { %p493_p4 = pneg %p492_p2 }
  0x60   : > { %v240_v15 = vmul.f32 %v362_v11, %v232_v12  ;;  %v241_v18 = vmul.f32 %v362_v11, %v233_v16  ;;  %p499_p6 = por %p498_p0, %p497_p5 }
  0x62   : > { %v246_v17 = vadd.f32 %v363_v14, %v240_v15  ;;  %v247_v19 = vadd.f32 %v363_v14, %v241_v18  ;;  %p500_p13 = pnand %p499_p6, %p493_p4 }
  0x64   : > { %248 = vst [vmem:[%s201_s19] sm:$0xff] %v246_v17  ;;  %249 = vst [vmem:[%s201_s19 + $0x8] sm:$0xff] %v247_v19 }
  0x65   : > { %503 = shalt.err (!%p500_p13)
}
  0x66   : > { %s504_s17 = scalar_lea.hbm %s752_s6, 256  ;;  %s508_s23 = scalar_lea.hbm %s799_s3, 512 }
  0x67   : > { %p505_p7 = scmp.ne.s32.totalorder %s752_s6, %s504_s17  ;;  %p509_p1 = scmp.lt.u32.totalorder %s752_s6, %s799_s3 }
  0x68   : > { %p510_p8 = scmp.lt.u32.totalorder %s508_s23, %s504_s17  ;;  %p512_p9 = scmp.lt.u32.totalorder %s504_s17, %s752_s6 }
  0x69   : > { %p506_p3 = pnand %p505_p7, %p818_p10 }
  0x6a   : > { %p511_p11 = por %p510_p8, %p509_p1 }
  0x6b   : > { %p507_p12 = pneg %p506_p3 }
  0x6c   : > { %p513_p2 = por %p512_p9, %p511_p11 }
  0x6e   : > { %p514_p4 = pnand %p513_p2, %p507_p12 }
  0x70   : > { %517 = shalt.err (!%p514_p4)
}
  0x71   : > { %s567_s29 = smov 128   ;;  %s568_s19 = smov 8  }
  0x72   : > { %377 = dma.vmem_to_hbm [thread:$0]  (%p818_p10), %s747_s20, 256, %s752_s6, %s251_s8, %s567_s29, %s567_s29, %s568_s19  }
  0x73 PF: > { %s279_s30 = sand.u32 1, %s548_s12   ;;  %p819_p5 = scmp.ne.s32.totalorder %s808_s25, 0 }
  0x74   : > { %p820_p0 = scmp.ge.s32.totalorder %s560_s15, 2  ;;  %s280_s22 = scalar_lea.sflag [#allocation4], %s279_s30 }
  0x76   : > { %p388_p6 = pnand %p820_p0, %p819_p5 }
  0x78   : > { %543 = dma.done.wait (!%p388_p6), %s280_s22, 256  }
  0x79   : > { %545 = vsyncadd (!%p388_p6), %s280_s22, 4294967040  ;;  %p17_p13 = scmp.ge.s32.totalorder %s614_s18, 4   ;;  %s821_s12 = smov %s552_s13 }
  0x7a   : > { %s822_s13 = smov %s556_s14  ;;  %s823_s14 = smov %s626_s21 }
  0x7b   : > { %s824_s15 = smov %s614_s18  ;;  %19 = sbr.rel (!%p17_p13) target bundleno = 6 (0x6), region = 81 }
  0x82   :  { %285 = vsyncpa [#allocation3], 1 }
  0x83   :  { %287 = vsyncpa [#allocation3 + $0x1], 1 }
  0x84   :  { %288 = vsyncpa [#allocation6], 1 }
  0x85   :  { %289 = vsyncpa [#allocation4], 1 }
  0x86   :  { %291 = vsyncpa [#allocation4 + $0x1], 1 }

</bundles_post_ra>
